<compile_context>
chip_gen: v5e
topology: v5e:2x2
jax: 0.10.0
libtpu: 0.0.40
codegen_flags: <defaults>
</compile_context>

<pallas_src>
import functools

import jax
import jax.numpy as jnp
from jax.experimental import pallas as pl
from jax.experimental.pallas import tpu as pltpu


def _round_up(x, m):
    return ((x + m - 1) // m) * m


def _make_focal_kernel(batch, tiles_per_partial, gamma, use_weights):
    """Builds the fused focal-loss kernel (weighted or unweighted variant)."""

    def kernel(*refs):
        if use_weights:
            logits_ref, tgt_ref, w_ref, o_ref, acc_ref = refs
        else:
            logits_ref, tgt_ref, o_ref, acc_ref = refs
            w_ref = None

        p = pl.program_id(0)          # reduction partial (parallel axis)
        t = pl.program_id(1)          # batch-tile step within the partial (arbitrary axis)

        @pl.when(t == 0)
        def _():
            acc_ref[...] = jnp.zeros_like(acc_ref)

        tb, c = logits_ref.shape                      # static block shape (TB, C)
        logits = logits_ref[...].astype(jnp.float32)  # cast-in-kernel: inputs stream in native dtype
        targets = tgt_ref[...].astype(jnp.float32)

        # --- cross-entropy with soft targets: ce = -sum(t * log_softmax(x)) ---
        m = jnp.max(logits, axis=1, keepdims=True)
        z = logits - m
        lse = jnp.log(jnp.sum(jnp.exp(z), axis=1, keepdims=True))
        logp = z - lse
        ce = -jnp.sum(targets * logp, axis=1, keepdims=True)        # (TB, 1)

        # --- focal factor ---
        pt = jnp.exp(-ce)
        focal = (1.0 - pt) ** gamma * ce                            # (TB, 1)

        if use_weights:
            # weights[argmax(targets)] as a vectorized masked-select (first-max tie-break,
            # matching torch/jnp argmax); no dynamic gather.
            col = jax.lax.broadcasted_iota(jnp.int32, (tb, c), 1)
            row_max = jnp.max(targets, axis=1, keepdims=True)
            is_max = targets == row_max
            first_idx = jnp.min(jnp.where(is_max, col, c), axis=1, keepdims=True)
            w_row = jnp.sum(jnp.where(col == first_idx, w_ref[...].astype(jnp.float32), 0.0),
                            axis=1, keepdims=True)                  # (TB, 1)
            vals = w_row * focal
        else:
            vals = focal

        # --- mask rows past the real batch (ragged last tile / clamped over-provisioned tiles) ---
        tile = p * tiles_per_partial + t
        row = jax.lax.broadcasted_iota(jnp.int32, (tb, 1), 0) + tile * tb
        acc_ref[...] += jnp.where(row < batch, vals, 0.0)           # select: garbage/NaN can't leak

        # --- write this partial's total once, to its own lane-aligned output slab ---
        @pl.when(t == pl.num_programs(1) - 1)
        def _():
            total = jnp.sum(acc_ref[...])
            lane = jax.lax.broadcasted_iota(jnp.int32, (1, 128), 1)
            o_ref[...] = jnp.where(lane == 0, total, 0.0)

    return kernel


def focal_loss(logits, targets, class_weights=None, gamma=2, alpha=False,
               block_b=1024, num_partials=2):
    """logits: (B, C); targets: (B, C) soft/one-hot probabilities; returns scalar focal loss."""
    B, C = logits.shape
    if float(gamma) == int(gamma):
        gamma = int(gamma)            # integer_pow path for the common gamma=2

    use_weights = bool(alpha) and class_weights is not None

    # Cap the batch tile so 2 inputs x 2 pipeline buffers stay well under the default scoped
    # VMEM limit on every generation (v5e default 16 MiB; v7x physical VMEM is only 64 MiB).
    in_bytes = jnp.dtype(logits.dtype).itemsize + jnp.dtype(targets.dtype).itemsize
    vmem_budget = 8 * 1024 * 1024
    tb_cap = max(8, (vmem_budget // (2 * C * in_bytes)) // 8 * 8)
    block_b = max(8, min(_round_up(block_b, 8), tb_cap))

    if B <= block_b:
        TB = B                        # block == full array dim: always layout-legal, single tile
    else:
        TB = block_b                  # multiple of 8; ragged last tile handled by the row mask

    num_tiles = pl.cdiv(B, TB)
    P = max(1, min(num_partials, num_tiles))   # reduction partials (useful on v7x: 2 TCs/chip)
    T = pl.cdiv(num_tiles, P)                  # batch tiles per partial

    def in_map(p, t):
        # Clamp over-provisioned tile indices (when P*T > num_tiles); those rows are masked anyway.
        return (jnp.minimum(p * T + t, num_tiles - 1), 0)

    in_specs = [
        pl.BlockSpec((TB, C), in_map),                 # logits tile (double-buffered)
        pl.BlockSpec((TB, C), in_map),                 # targets tile (double-buffered)
    ]
    operands = [logits, targets]
    if use_weights:
        w = jnp.asarray(class_weights, jnp.float32).reshape(1, C)
        in_specs.append(pl.BlockSpec((1, C), lambda p, t: (0, 0)))  # VMEM-resident weights row
        operands.append(w)

    kernel = _make_focal_kernel(B, T, gamma, use_weights)

    out = pl.pallas_call(
        kernel,
        out_shape=jax.ShapeDtypeStruct((1, P * 128), jnp.float32),
        grid_spec=pltpu.PrefetchScalarGridSpec(
            num_scalar_prefetch=0,
            grid=(P, T),
            in_specs=in_specs,
            # Each partial owns its own lane-aligned 128-wide slab; written once per partial.
            out_specs=pl.BlockSpec((1, 128), lambda p, t: (0, p)),
            scratch_shapes=[pltpu.VMEM((TB, 1), jnp.float32)],      # per-row partial sums
        ),
        compiler_params=pltpu.CompilerParams(
            dimension_semantics=("parallel", "arbitrary")),
    )(*operands)

    return jnp.sum(out) / B


def focal_loss_ref(logits, targets, class_weights=None, gamma=2, alpha=False):
    """Pure-JAX reference matching the PyTorch module."""
    logp = jax.nn.log_softmax(logits.astype(jnp.float32), axis=1)
    ce = -jnp.sum(targets.astype(jnp.float32) * logp, axis=1)
    pt = jnp.exp(-ce)
    cls = jnp.argmax(targets, axis=1)
    if alpha and class_weights is not None:
        w = jnp.asarray(class_weights, jnp.float32)[cls]
        return jnp.mean(w * (1.0 - pt) ** gamma * ce)
    return jnp.mean((1.0 - pt) ** gamma * ce)


if __name__ == "__main__":
    key = jax.random.PRNGKey(0)
    k1, k2, k3 = jax.random.split(key, 3)

    batch, num_classes = 100, 7       # small shapes; C deliberately not a multiple of 128
    logits = 2.0 * jax.random.normal(k1, (batch, num_classes), jnp.float32)
    labels = jax.random.randint(k2, (batch,), 0, num_classes)
    targets = jax.nn.one_hot(labels, num_classes, dtype=jnp.float32)
    class_weights = jax.random.uniform(k3, (num_classes,), jnp.float32, 0.5, 2.0)

    # Default config: single batch tile, weighted and unweighted kernel variants.
    loss_w = focal_loss(logits, targets, class_weights, gamma=2, alpha=True)
    loss_u = focal_loss(logits, targets, gamma=2, alpha=False)

    # Small-tile config: 4 batch tiles (ragged last tile) split across 2 reduction partials.
    loss_w_t = focal_loss(logits, targets, class_weights, gamma=2, alpha=True,
                          block_b=32, num_partials=2)

    # Native low-precision input path (cast to f32 inside the kernel, no wrapper upcast/copy).
    logits_bf16 = logits.astype(jnp.bfloat16)
    targets_bf16 = targets.astype(jnp.bfloat16)
    loss_bf16 = focal_loss(logits_bf16, targets_bf16, class_weights, gamma=2, alpha=True)

    loss_w, loss_u, loss_w_t, loss_bf16 = jax.block_until_ready(
        (loss_w, loss_u, loss_w_t, loss_bf16))

    ref_w = focal_loss_ref(logits, targets, class_weights, gamma=2, alpha=True)
    ref_u = focal_loss_ref(logits, targets, gamma=2, alpha=False)
    ref_bf16 = focal_loss_ref(logits_bf16.astype(jnp.float32),
                              targets_bf16.astype(jnp.float32),
                              class_weights, gamma=2, alpha=True)

    assert loss_w.shape == () and loss_u.shape == () and loss_w_t.shape == ()
    assert jnp.allclose(loss_w, ref_w, atol=1e-5, rtol=1e-5), (loss_w, ref_w)
    assert jnp.allclose(loss_u, ref_u, atol=1e-5, rtol=1e-5), (loss_u, ref_u)
    assert jnp.allclose(loss_w_t, ref_w, atol=1e-5, rtol=1e-5), (loss_w_t, ref_w)
    assert jnp.allclose(loss_bf16, ref_bf16, atol=1e-4, rtol=1e-4), (loss_bf16, ref_bf16)

    print("KERNEL_OK")
</pallas_src>

<mosaic_0001>
module attributes {stable_mosaic.version = 11 : i64} {
  func.func @kernel(%arg0: i32, %arg1: i32, %arg2: memref<100x7xf32, #tpu.memory_space<vmem>>, %arg3: memref<100x7xf32, #tpu.memory_space<vmem>>, %arg4: memref<1x7xf32, #tpu.memory_space<vmem>>, %arg5: memref<1x128xf32, #tpu.memory_space<vmem>>, %arg6: memref<100x1xf32, #tpu.memory_space<vmem>>) attributes {dimension_semantics = [#tpu.dimension_semantics<parallel>, #tpu.dimension_semantics<arbitrary>], iteration_bounds = array<i64: 1, 1>, scalar_prefetch = 0 : i64, scratch_operands = 1 : i64, tpu.core_type = #tpu.core_type<tc>, window_params = [{transform_indices = @transform_0, window_bounds = array<i64: 100, 7>}, {transform_indices = @transform_1, window_bounds = array<i64: 100, 7>}, {pipeline_mode = #tpu.pipeline_mode<synchronous>, transform_indices = @transform_2, window_bounds = array<i64: 1, 7>}, {transform_indices = @transform_3, window_bounds = array<i64: 1, 128>}]} {
    %c0_i32 = arith.constant 0 : i32
    %0 = arith.cmpi eq, %arg1, %c0_i32 : i32
    %1 = arith.extui %0 : i1 to i32
    %c0_i32_0 = arith.constant 0 : i32
    %2 = arith.cmpi ne, %1, %c0_i32_0 : i32
    scf.if %2 {
      %cst_23 = arith.constant 0.000000e+00 : f32
      %62 = vector.broadcast %cst_23 : f32 to vector<100x1xf32>
      %c0_24 = arith.constant 0 : index
      %c0_25 = arith.constant 0 : index
      %63 = vector.load %arg6[%c0_24, %c0_25] : memref<100x1xf32, #tpu.memory_space<vmem>>, vector<100x1xf32>
      tpu.vector_store %arg6[%c0_24, %c0_25], %62 {strides = array<i32>} : memref<100x1xf32, #tpu.memory_space<vmem>>, vector<100x1xf32>,
    } else {
    }
    %c0 = arith.constant 0 : index
    %c0_1 = arith.constant 0 : index
    %3 = vector.load %arg2[%c0, %c0_1] : memref<100x7xf32, #tpu.memory_space<vmem>>, vector<100x7xf32>
    %c0_2 = arith.constant 0 : index
    %c0_3 = arith.constant 0 : index
    %4 = vector.load %arg3[%c0_2, %c0_3] : memref<100x7xf32, #tpu.memory_space<vmem>>, vector<100x7xf32>
    %cst = arith.constant dense<0xFF800000> : vector<100xf32>
    %5 = vector.multi_reduction <maximumf>, %3, %cst [1] : vector<100x7xf32> to vector<100xf32>
    %6 = vector.shape_cast %5 : vector<100xf32> to vector<100x1xf32>
    %7 = vector.broadcast %6 : vector<100x1xf32> to vector<100x7xf32>
    %8 = arith.subf %3, %7 : vector<100x7xf32>
    %9 = math.exp %8 : vector<100x7xf32>
    %cst_4 = arith.constant dense<0.000000e+00> : vector<100xf32>
    %10 = vector.multi_reduction <add>, %9, %cst_4 [1] : vector<100x7xf32> to vector<100xf32>
    %11 = vector.shape_cast %10 : vector<100xf32> to vector<100x1xf32>
    %12 = math.log %11 : vector<100x1xf32>
    %13 = vector.broadcast %12 : vector<100x1xf32> to vector<100x7xf32>
    %14 = arith.subf %8, %13 : vector<100x7xf32>
    %15 = arith.mulf %4, %14 : vector<100x7xf32>
    %cst_5 = arith.constant dense<0.000000e+00> : vector<100xf32>
    %16 = vector.multi_reduction <add>, %15, %cst_5 [1] : vector<100x7xf32> to vector<100xf32>
    %17 = vector.shape_cast %16 : vector<100xf32> to vector<100x1xf32>
    %cst_6 = arith.constant 0.000000e+00 : f32
    %18 = vector.broadcast %cst_6 : f32 to vector<100x1xf32>
    %19 = arith.subf %18, %17 : vector<100x1xf32>
    %cst_7 = arith.constant 0.000000e+00 : f32
    %20 = vector.broadcast %cst_7 : f32 to vector<100x1xf32>
    %21 = arith.subf %20, %19 : vector<100x1xf32>
    %22 = math.exp %21 : vector<100x1xf32>
    %cst_8 = arith.constant 1.000000e+00 : f32
    %23 = vector.broadcast %cst_8 : f32 to vector<100x1xf32>
    %24 = arith.subf %23, %22 : vector<100x1xf32>
    %25 = arith.mulf %24, %24 : vector<100x1xf32>
    %26 = arith.mulf %25, %19 : vector<100x1xf32>
    %27 = tpu.iota {dimensions = array<i32: 1>} : vector<100x7xi32>
    %cst_9 = arith.constant dense<0xFF800000> : vector<100xf32>
    %28 = vector.multi_reduction <maximumf>, %4, %cst_9 [1] : vector<100x7xf32> to vector<100xf32>
    %29 = vector.shape_cast %28 : vector<100xf32> to vector<100x1xf32>
    %30 = vector.broadcast %29 : vector<100x1xf32> to vector<100x7xf32>
    %31 = arith.cmpf oeq, %4, %30 : vector<100x7xf32>
    %c7_i32 = arith.constant 7 : i32
    %32 = vector.broadcast %c7_i32 : i32 to vector<100x7xi32>
    %33 = arith.select %31, %27, %32 : vector<100x7xi1>, vector<100x7xi32>
    %cst_10 = arith.constant dense<2147483647> : vector<100xi32>
    %34 = vector.multi_reduction <minsi>, %33, %cst_10 [1] : vector<100x7xi32> to vector<100xi32>
    %35 = vector.shape_cast %34 : vector<100xi32> to vector<100x1xi32>
    %36 = vector.broadcast %35 : vector<100x1xi32> to vector<100x7xi32>
    %37 = arith.cmpi eq, %27, %36 : vector<100x7xi32>
    %c0_11 = arith.constant 0 : index
    %c0_12 = arith.constant 0 : index
    %38 = vector.load %arg4[%c0_11, %c0_12] : memref<1x7xf32, #tpu.memory_space<vmem>>, vector<1x7xf32>
    %cst_13 = arith.constant 0.000000e+00 : f32
    %39 = vector.shape_cast %38 : vector<1x7xf32> to vector<1x7xf32>
    %40 = vector.broadcast %39 : vector<1x7xf32> to vector<100x7xf32>
    %41 = vector.broadcast %cst_13 : f32 to vector<100x7xf32>
    %42 = arith.select %37, %40, %41 : vector<100x7xi1>, vector<100x7xf32>
    %cst_14 = arith.constant dense<0.000000e+00> : vector<100xf32>
    %43 = vector.multi_reduction <add>, %42, %cst_14 [1] : vector<100x7xf32> to vector<100xf32>
    %44 = vector.shape_cast %43 : vector<100xf32> to vector<100x1xf32>
    %45 = arith.mulf %44, %26 : vector<100x1xf32>
    %c1_i32 = arith.constant 1 : i32
    %46 = arith.muli %arg0, %c1_i32 : i32
    %47 = arith.addi %46, %arg1 : i32
    %48 = tpu.iota {dimensions = array<i32: 0>} : vector<100x1xi32>
    %c100_i32 = arith.constant 100 : i32
    %49 = arith.muli %47, %c100_i32 : i32
    %50 = vector.broadcast %49 : i32 to vector<100x1xi32>
    %51 = arith.addi %48, %50 : vector<100x1xi32>
    %c0_15 = arith.constant 0 : index
    %c0_16 = arith.constant 0 : index
    %52 = vector.load %arg6[%c0_15, %c0_16] : memref<100x1xf32, #tpu.memory_space<vmem>>, vector<100x1xf32>
    %c100_i32_17 = arith.constant 100 : i32
    %53 = vector.broadcast %c100_i32_17 : i32 to vector<100x1xi32>
    %54 = arith.cmpi slt, %51, %53 : vector<100x1xi32>
    %cst_18 = arith.constant 0.000000e+00 : f32
    %55 = vector.broadcast %cst_18 : f32 to vector<100x1xf32>
    %56 = arith.select %54, %45, %55 : vector<100x1xi1>, vector<100x1xf32>
    %57 = arith.addf %52, %56 : vector<100x1xf32>
    %c0_19 = arith.constant 0 : index
    %c0_20 = arith.constant 0 : index
    %58 = vector.load %arg6[%c0_19, %c0_20] : memref<100x1xf32, #tpu.memory_space<vmem>>, vector<100x1xf32>
    tpu.vector_store %arg6[%c0_19, %c0_20], %57 {strides = array<i32>} : memref<100x1xf32, #tpu.memory_space<vmem>>, vector<100x1xf32>,
    %c0_i32_21 = arith.constant 0 : i32
    %59 = arith.cmpi eq, %arg1, %c0_i32_21 : i32
    %60 = arith.extui %59 : i1 to i32
    %c0_i32_22 = arith.constant 0 : i32
    %61 = arith.cmpi ne, %60, %c0_i32_22 : i32
    scf.if %61 {
      %c0_23 = arith.constant 0 : index
      %c0_24 = arith.constant 0 : index
      %62 = vector.load %arg6[%c0_23, %c0_24] : memref<100x1xf32, #tpu.memory_space<vmem>>, vector<100x1xf32>
      %63 = vector.shape_cast %62 : vector<100x1xf32> to vector<1x100x1xf32>
      %cst_25 = arith.constant dense<0.000000e+00> : vector<1xf32>
      %64 = vector.multi_reduction <add>, %63, %cst_25 [1, 2] : vector<1x100x1xf32> to vector<1xf32>
      %65 = vector.shape_cast %64 : vector<1xf32> to vector<1x1x1xf32>
      %66 = vector.extract %65[0, 0, 0] : f32 from vector<1x1x1xf32>
      %67 = tpu.iota {dimensions = array<i32: 1>} : vector<1x128xi32>
      %c0_i32_26 = arith.constant 0 : i32
      %68 = vector.broadcast %c0_i32_26 : i32 to vector<1x128xi32>
      %69 = arith.cmpi eq, %67, %68 : vector<1x128xi32>
      %cst_27 = arith.constant 0.000000e+00 : f32
      %70 = vector.broadcast %66 : f32 to vector<1x128xf32>
      %71 = vector.broadcast %cst_27 : f32 to vector<1x128xf32>
      %72 = arith.select %69, %70, %71 : vector<1x128xi1>, vector<1x128xf32>
      %c0_28 = arith.constant 0 : index
      %c0_29 = arith.constant 0 : index
      %73 = vector.load %arg5[%c0_28, %c0_29] : memref<1x128xf32, #tpu.memory_space<vmem>>, vector<1x128xf32>
      tpu.vector_store %arg5[%c0_28, %c0_29], %72 {strides = array<i32>} : memref<1x128xf32, #tpu.memory_space<vmem>>, vector<1x128xf32>,
    } else {
    }
    return
  }
  func.func @transform_0(%arg0: i32, %arg1: i32) -> (i32, i32) {
    %c1_i32 = arith.constant 1 : i32
    %0 = arith.muli %arg0, %c1_i32 : i32
    %1 = arith.addi %0, %arg1 : i32
    %c0_i32 = arith.constant 0 : i32
    %2 = arith.minsi %1, %c0_i32 : i32
    %c0_i32_0 = arith.constant 0 : i32
    %c0_i32_1 = arith.constant 0 : i32
    return %2, %c0_i32_0 : i32, i32
  }
  func.func @transform_1(%arg0: i32, %arg1: i32) -> (i32, i32) {
    %c1_i32 = arith.constant 1 : i32
    %0 = arith.muli %arg0, %c1_i32 : i32
    %1 = arith.addi %0, %arg1 : i32
    %c0_i32 = arith.constant 0 : i32
    %2 = arith.minsi %1, %c0_i32 : i32
    %c0_i32_0 = arith.constant 0 : i32
    %c0_i32_1 = arith.constant 0 : i32
    return %2, %c0_i32_0 : i32, i32
  }
  func.func @transform_2(%arg0: i32, %arg1: i32) -> (i32, i32) {
    %c0_i32 = arith.constant 0 : i32
    %c0_i32_0 = arith.constant 0 : i32
    %c0_i32_1 = arith.constant 0 : i32
    return %c0_i32, %c0_i32_0 : i32, i32
  }
  func.func @transform_3(%arg0: i32, %arg1: i32) -> (i32, i32) {
    %c0_i32 = arith.constant 0 : i32
    %c0_i32_0 = arith.constant 0 : i32
    return %c0_i32, %arg0 : i32, i32
  }
}

</mosaic_0001>

<bundles_post_ra>
// kernel: tpu_custom_call.1
= control target key start
LH: loop header
LB: loop body
LE: loop exit
PB: predicated region body
PF: predicated region fallthrough
CT: control target
= control target key end

     0   :  { %vm124_vm0 = vcmask 56320   ;;  %s1740_s0 = inlined_call_operand.vmem [shape: f32[100,7], index: 0, kind: input, shape index: {}]   ;;  %s1741_s1 = inlined_call_operand.vmem [shape: f32[100,7], index: 1, kind: input, shape index: {}]   ;;  %s1742_s2 = inlined_call_operand.vmem [shape: f32[1,7], index: 2, kind: input, shape index: {}]   ;;  %s1743_s3 = inlined_call_operand.hbm [shape: f32[1,128], index: 3, kind: output, shape index: {}]  }
   0x1   :  { %v1082_v0 = vld [vmem:[%s1741_s1 + $0x20] sm:$0xff]  ;;  %v1087_v1 = vld [vmem:[%s1741_s1 + $0x10] sm:$0xff]  ;;  %v1103_v6 = vld [vmem:[%s1741_s1 + $0x28] sm:$0xff] }
   0x2   :  { %v1092_v2 = vld [vmem:[%s1741_s1] sm:$0xff]  ;;  %v439_v3 = vsel %vm124_vm0, %v1082_v0, -inf  ;;  %v433_v4 = vsel %vm124_vm0, %v1087_v1, -inf  ;;  %v1108_v7 = vld [vmem:[%s1741_s1 + $0x18] sm:$0xff]  ;;  %v1113_v8 = vld [vmem:[%s1741_s1 + $0x8] sm:$0xff] }
   0x3   :  { %v427_v5 = vsel %vm124_vm0, %v1092_v2, -inf  ;;  %440 = vmax.xlane.f32.xlu2 %v439_v3  ;;  %434 = vmax.xlane.f32.xlu1 %v433_v4 }
   0x4   :  { %428 = vmax.xlane.f32.xlu0 %v427_v5 }
   0x5   :  { %8 = vsyncpa [#allocation4], 0  ;;  %v442_v9 = vsel %vm124_vm0, %v1103_v6, -inf  ;;  %v436_v10 = vsel %vm124_vm0, %v1108_v7, -inf  ;;  %v430_v11 = vsel %vm124_vm0, %v1113_v8, -inf  ;;  %v1124_v12 = vld [vmem:[%s1740_s0 + $0x8] sm:$0xff]  ;;  %v1744_v52 = vlaneseq }
   0x6   :  { %v1129_v13 = vld [vmem:[%s1740_s0] sm:$0xff]  ;;  %v1134_v14 = vld [vmem:[%s1741_s1 + $0x30] sm:$0xff]  ;;  %v128_v15 = vsel %vm124_vm0, %v1124_v12, -inf  ;;  %v1155_v20 = vld [vmem:[%s1741_s1 + $0x38] sm:$0xff]  ;;  %vm161_vm1 = vcmask 52224   ;;  %s927_s13 = sshll.u32 %s1743_s3, 4  ;;  %s928_s13 = int_to_ptr.hbm [resolvable:$true] %s927_s13 }
   0x7   :  { %v125_v16 = vsel %vm124_vm0, %v1129_v13, -inf  ;;  %v445_v17 = vsel %vm124_vm0, %v1134_v14, -inf  ;;  %v1145_v18 = vld [vmem:[%s1741_s1 + $0x40] sm:$0xff]  ;;  %v1150_v19 = vld [vmem:[%s1740_s0 + $0x10] sm:$0xff]  ;;  %v448_v23 = vsel %vm124_vm0, %v1155_v20, -inf  ;;  %v1171_v25 = vld [vmem:[%s1741_s1 + $0x48] sm:$0xff] }
   0x8   :  { %v451_v21 = vsel %vm124_vm0, %v1145_v18, -inf  ;;  %v131_v22 = vsel %vm124_vm0, %v1150_v19, -inf  ;;  %v1166_v24 = vld [vmem:[%s1740_s0 + $0x20] sm:$0xff]  ;;  %v1176_v26 = vld [vmem:[%s1740_s0 + $0x18] sm:$0xff]  ;;  %v454_v28 = vsel %vm124_vm0, %v1171_v25, -inf  ;;  %v1192_v31 = vld [vmem:[%s1740_s0 + $0x28] sm:$0xff] }
   0x9   :  { %v137_v27 = vsel %vm124_vm0, %v1166_v24, -inf  ;;  %v134_v29 = vsel %vm124_vm0, %v1176_v26, -inf  ;;  %v1187_v30 = vld [vmem:[%s1741_s1 + $0x58] sm:$0xff]  ;;  %v1197_v32 = vld [vmem:[%s1741_s1 + $0x50] sm:$0xff]  ;;  %v140_v34 = vsel %vm124_vm0, %v1192_v31, -inf  ;;  %v1234_v43 = vld [vmem:[%s1740_s0 + $0x48] sm:$0xff] }
   0xa   :  { %1750 = vst [vmem:[#allocation6_spill] sm:$0xff] %v1187_v30  ;;  %v460_v33 = vsel %vm124_vm0, %v1187_v30, -inf  ;;  %v457_v35 = vsel %vm124_vm0, %v1197_v32, -inf  ;;  %v1208_v36 = vld [vmem:[%s1741_s1 + $0x60] sm:$0xf]  ;;  %v1213_v37 = vld [vmem:[%s1740_s0 + $0x38] sm:$0xff] }
   0xb   :  { %443 = vmax.xlane.f32.xlu2 %v442_v9  ;;  %437 = vmax.xlane.f32.xlu1 %v436_v10  ;;  %1751 = vst [vmem:[#allocation7_spill] sm:$0xff] %v1197_v32  ;;  %v1218_v38 = vld [vmem:[%s1740_s0 + $0x30] sm:$0xff]  ;;  %v463_v39 = vsel %vm161_vm1, %v1208_v36, -inf  ;;  %v146_v40 = vsel %vm124_vm0, %v1213_v37, -inf  ;;  %v1239_v44 = vld [vmem:[%s1740_s0 + $0x40] sm:$0xff]  ;;  %v152_v46 = vsel %vm124_vm0, %v1234_v43, -inf }
   0xc   :  { %431 = vmax.xlane.f32.xlu0 %v430_v11  ;;  %1752 = vst [vmem:[#allocation8_spill] sm:$0xff] %v1208_v36  ;;  %v143_v41 = vsel %vm124_vm0, %v1218_v38, -inf  ;;  %v1229_v42 = vld [vmem:[%s1740_s0 + $0x50] sm:$0xff]  ;;  %v149_v47 = vsel %vm124_vm0, %v1239_v44, -inf  ;;  %v1250_v48 = vld [vmem:[%s1740_s0 + $0x60] sm:$0xf] }
   0xd   :  { %v155_v45 = vsel %vm124_vm0, %v1229_v42, -inf  ;;  %v1255_v49 = vld [vmem:[%s1740_s0 + $0x58] sm:$0xff]  ;;  %v162_v50 = vsel %vm161_vm1, %v1250_v48, -inf  ;;  %v1262_v53 = vand.u32 127, %v1744_v52 }
   0xe   :  { %v158_v51 = vsel %vm124_vm0, %v1255_v49, -inf }
   0xf   :  { %1753 = vst [vmem:[#allocation9_spill] sm:$0xff] %v1262_v53 }
  0x13   :  { %129 = vmax.xlane.f32.xlu2 %v128_v15  ;;  %126 = vmax.xlane.f32.xlu1 %v125_v16 }
  0x14   :  { %446 = vmax.xlane.f32.xlu0 %v445_v17 }
  0x1b   :  { %452 = vmax.xlane.f32.xlu2 %v451_v21  ;;  %132 = vmax.xlane.f32.xlu1 %v131_v22 }
  0x1c   :  { %449 = vmax.xlane.f32.xlu0 %v448_v23 }
  0x23   :  { %138 = vmax.xlane.f32.xlu2 %v137_v27  ;;  %455 = vmax.xlane.f32.xlu1 %v454_v28 }
  0x24   :  { %135 = vmax.xlane.f32.xlu0 %v134_v29 }
  0x2b   :  { %461 = vmax.xlane.f32.xlu2 %v460_v33  ;;  %141 = vmax.xlane.f32.xlu1 %v140_v34 }
  0x2c   :  { %458 = vmax.xlane.f32.xlu0 %v457_v35 }
  0x33   :  { %464 = vmax.xlane.f32.xlu1 %v463_v39  ;;  %147 = vmax.xlane.f32.xlu2 %v146_v40 }
  0x34   :  { %144 = vmax.xlane.f32.xlu0 %v143_v41 }
  0x3b   :  { %156 = vmax.xlane.f32.xlu2 %v155_v45  ;;  %153 = vmax.xlane.f32.xlu1 %v152_v46 }
  0x3c   :  { %150 = vmax.xlane.f32.xlu0 %v149_v47 }
  0x43   :  { %163 = vmax.xlane.f32.xlu1 %v162_v50 }
  0x44   :  { %159 = vmax.xlane.f32.xlu0 %v158_v51 }
  0x76   :  { %v441_v54 = vpop.xlane.xlu2 %440  ;;  %v435_v55 = vpop.xlane.xlu1 %434 }
  0x77   :  { %vm468_vm2 = vcmp.eq.f32.partialorder %v1087_v1, %v435_v55  ;;  %v429_v56 = vpop.xlane.xlu0 %428  ;;  %vm470_vm6 = vcmp.eq.f32.partialorder %v1082_v0, %v441_v54 }
  0x78   :  { %v481_v57 = vsel %vm468_vm2, %v1262_v53, 7  ;;  %vm466_vm3 = vcmp.eq.f32.partialorder %v1092_v2, %v429_v56  ;;  %v483_v27 = vsel %vm470_vm6, %v1262_v53, 7 }
  0x79   :  { %v1268_v58 = vsel %vm124_vm0, %v481_v57, 2147483647  ;;  %v479_v59 = vsel %vm466_vm3, %v1262_v53, 7  ;;  %v1309_v35 = vsel %vm124_vm0, %v483_v27, 2147483647 }
  0x7a   :  { %v1272_v60 = vsel %vm124_vm0, %v479_v59, 2147483647  ;;  %v524_v61 = vshra.s32 %v1268_v58, 16  ;;  %v554_v46 = vshra.s32 %v1309_v35, 16 }
  0x7b   :  { %v494_v62 = vshra.s32 %v1272_v60, 16 }
  0x7c   :  { %v1276_v63 = vcvt.s32.f32 %v524_v61  ;;  %v1321_v51 = vcvt.s32.f32 %v554_v46 }
  0x7d   :  { %v1278_v3 = vcvt.s32.f32 %v494_v62 }
  0x7e   :  { %v444_v4 = vpop.xlane.xlu2 %443  ;;  %v438_v5 = vpop.xlane.xlu1 %437  ;;  %527 = vmin.xlane.f32.xlu1 %v1276_v63 }
  0x7f   :  { %vm471_vm4 = vcmp.eq.f32.partialorder %v1103_v6, %v444_v4  ;;  %vm469_vm5 = vcmp.eq.f32.partialorder %v1108_v7, %v438_v5  ;;  %v432_v9 = vpop.xlane.xlu0 %431  ;;  %497 = vmin.xlane.f32.xlu2 %v1278_v3 }
  0x80   :  { %v484_v10 = vsel %vm471_vm4, %v1262_v53, 7  ;;  %v482_v11 = vsel %vm469_vm5, %v1262_v53, 7  ;;  %vm467_vm7 = vcmp.eq.f32.partialorder %v1113_v8, %v432_v9 }
  0x81   :  { %v1289_v15 = vsel %vm124_vm0, %v484_v10, 2147483647  ;;  %v1292_v16 = vsel %vm124_vm0, %v482_v11, 2147483647  ;;  %v480_v17 = vsel %vm467_vm7, %v1262_v53, 7 }
  0x82   :  { %v1296_v21 = vsel %vm124_vm0, %v480_v17, 2147483647  ;;  %v539_v22 = vshra.s32 %v1292_v16, 16  ;;  %v569_v23 = vshra.s32 %v1289_v15, 16 }
  0x83   :  { %v509_v28 = vshra.s32 %v1296_v21, 16 }
  0x84   :  { %v1302_v29 = vcvt.s32.f32 %v539_v22  ;;  %v1304_v33 = vcvt.s32.f32 %v569_v23 }
  0x85   :  { %v1306_v34 = vcvt.s32.f32 %v509_v28 }
  0x86   :  { %v130_v39 = vpop.xlane.xlu2 %129  ;;  %572 = vmin.xlane.f32.xlu1 %v1304_v33  ;;  %v127_v40 = vpop.xlane.xlu1 %126 }
  0x87   :  { %v447_v41 = vpop.xlane.xlu0 %446  ;;  %512 = vmin.xlane.f32.xlu0 %v1306_v34  ;;  %542 = vmin.xlane.f32.xlu2 %v1302_v29 }
  0x88   :  { %vm472_vm8 = vcmp.eq.f32.partialorder %v1134_v14, %v447_v41 }
  0x89   :  { %v485_v45 = vsel %vm472_vm8, %v1262_v53, 7 }
  0x8a   :  { %v1318_v47 = vsel %vm124_vm0, %v485_v45, 2147483647 }
  0x8b   :  { %v584_v50 = vshra.s32 %v1318_v47, 16 }
  0x8d   :  { %v1323_v54 = vcvt.s32.f32 %v584_v50  ;;  %v1356_v50 = vsub.f32 %v1129_v13, %v127_v40 }
  0x8e   :  { %v453_v55 = vpop.xlane.xlu2 %452  ;;  %v133_v56 = vpop.xlane.xlu1 %132 }
  0x8f   :  { %v450_v57 = vpop.xlane.xlu0 %449  ;;  %557 = vmin.xlane.f32.xlu0 %v1321_v51  ;;  %587 = vmin.xlane.f32.xlu2 %v1323_v54  ;;  %vm474_vm9 = vcmp.eq.f32.partialorder %v1145_v18, %v453_v55 }
  0x90   :  { %vm473_vm10 = vcmp.eq.f32.partialorder %v1155_v20, %v450_v57  ;;  %v487_v59 = vsel %vm474_vm9, %v1262_v53, 7 }
  0x91   :  { %v486_v61 = vsel %vm473_vm10, %v1262_v53, 7  ;;  %v1332_v62 = vsel %vm124_vm0, %v487_v59, 2147483647 }
  0x92   :  { %v1335_v4 = vsel %vm124_vm0, %v486_v61, 2147483647  ;;  %v614_v5 = vshra.s32 %v1332_v62, 16  ;;  %v178_v61 = vmul.f32 1.442695, %v1356_v50 }
  0x93   :  { %v599_v9 = vshra.s32 %v1335_v4, 16 }
  0x94   :  { %v1339_v10 = vcvt.s32.f32 %v614_v5 }
  0x95   :  { %v1341_v11 = vcvt.s32.f32 %v599_v9 }
  0x96   :  { %v139_v17 = vpop.xlane.xlu2 %138  ;;  %617 = vmin.xlane.f32.xlu1 %v1339_v10  ;;  %v456_v22 = vpop.xlane.xlu1 %455 }
  0x97   :  { %602 = vmin.xlane.f32.xlu0 %v1341_v11  ;;  %v136_v23 = vpop.xlane.xlu0 %135  ;;  %vm475_vm11 = vcmp.eq.f32.partialorder %v1171_v25, %v456_v22  ;;  %v1359_v55 = vsub.f32 %v1166_v24, %v139_v17 }
  0x98   :  { %v1347_v27 = vsub.f32 %v1176_v26, %v136_v23  ;;  %v488_v28 = vsel %vm475_vm11, %v1262_v53, 7 }
  0x99   :  { %v1351_v41 = vsel %vm124_vm0, %v488_v28, 2147483647  ;;  %v186_v9 = vmul.f32 1.442695, %v1359_v55 }
  0x9a   :  { %v184_v45 = vmul.f32 1.442695, %v1347_v27  ;;  %v629_v46 = vshra.s32 %v1351_v41, 16 }
  0x9c   :  { %953 = vpow2.f32 %v184_v45  ;;  %v1361_v57 = vcvt.s32.f32 %v629_v46  ;;  %v1379_v45 = vsub.f32 %v1150_v19, %v133_v56 }
  0x9d   :  { %955 = vpow2.f32 %v178_v61 }
  0x9e   :  { %v462_v26 = vpop.xlane.xlu2 %461  ;;  %632 = vmin.xlane.f32.xlu1 %v1361_v57  ;;  %v142_v59 = vpop.xlane.xlu1 %141  ;;  %957 = vpow2.f32 %v186_v9 }
  0x9f   :  { %v459_v5 = vpop.xlane.xlu0 %458  ;;  %vm477_vm12 = vcmp.eq.f32.partialorder %v1187_v30, %v462_v26  ;;  %v1384_v26 = vsub.f32 %v1124_v12, %v130_v39  ;;  %v182_v12 = vmul.f32 1.442695, %v1379_v45 }
  0xa0   :  { %vm476_vm13 = vcmp.eq.f32.partialorder %v1197_v32, %v459_v5  ;;  %v490_v13 = vsel %vm477_vm12, %v1262_v53, 7 }
  0xa1   :  { %v489_v24 = vsel %vm476_vm13, %v1262_v53, 7  ;;  %v1371_v40 = vsel %vm124_vm0, %v490_v13, 2147483647 }
  0xa2   :  { %v954_v17 = vpop.eup %953  ;;  %v1374_v22 = vsel %vm124_vm0, %v489_v24, 2147483647  ;;  %v659_v23 = vshra.s32 %v1371_v40, 16 }
  0xa3   :  { %v644_v28 = vshra.s32 %v1374_v22, 16  ;;  %v213_v13 = vsel %vm124_vm0, %v954_v17, 0.0  ;;  %v956_v9 = vpop.eup %955  ;;  %v180_v17 = vmul.f32 1.442695, %v1384_v26 }
  0xa4   :  { %v1381_v46 = vcvt.s32.f32 %v659_v23 }
  0xa5   :  { %v1386_v5 = vcvt.s32.f32 %v644_v28 }
  0xa6   :  { %662 = vmin.xlane.f32.xlu2 %v1381_v46  ;;  %214 = vadd.xlane.f32.xlu1 %v213_v13  ;;  %v465_v24 = vpop.xlane.xlu1 %464  ;;  %v148_v61 = vpop.xlane.xlu2 %147 }
  0xa7   :  { %647 = vmin.xlane.f32.xlu0 %v1386_v5  ;;  %vm478_vm14 = vcmp.eq.f32.partialorder %v1208_v36, %v465_v24  ;;  %v1393_v19 = vsub.f32 %v1213_v37, %v148_v61  ;;  %v145_v56 = vpop.xlane.xlu0 %144  ;;  %v958_v13 = vpop.eup %957  ;;  %v1407_v37 = vsub.f32 %v1192_v31, %v142_v59 }
  0xa8   :  { %v491_v39 = vsel %vm478_vm14, %v1262_v53, 7  ;;  %v1404_v24 = vsub.f32 %v1218_v38, %v145_v56  ;;  %v204_v53 = vsel %vm124_vm0, %v956_v9, 0.0 }
  0xa9   :  { %v1399_v23 = vsel %vm161_vm1, %v491_v39, 2147483647  ;;  %v192_v28 = vmul.f32 1.442695, %v1393_v19  ;;  %v216_v39 = vsel %vm124_vm0, %v958_v13, 0.0 }
  0xaa   :  { %v674_v52 = vshra.s32 %v1399_v23, 16  ;;  %v190_v30 = vmul.f32 1.442695, %v1404_v24 }
  0xab   :  { %959 = vpow2.f32 %v192_v28 }
  0xac   :  { %961 = vpow2.f32 %v182_v12  ;;  %v1409_v61 = vcvt.s32.f32 %v674_v52  ;;  %v188_v52 = vmul.f32 1.442695, %v1407_v37 }
  0xad   :  { %963 = vpow2.f32 %v180_v17 }
  0xae   :  { %205 = vadd.xlane.f32.xlu2 %v204_v53  ;;  %217 = vadd.xlane.f32.xlu1 %v216_v39  ;;  %v157_v36 = vpop.xlane.xlu2 %156  ;;  %v154_v32 = vpop.xlane.xlu1 %153  ;;  %965 = vpow2.f32 %v190_v30 }
  0xaf   :  { %677 = vmin.xlane.f32.xlu0 %v1409_v61  ;;  %v1416_v38 = vsub.f32 %v1229_v42, %v157_v36  ;;  %v151_v31 = vpop.xlane.xlu0 %150  ;;  %v1425_v28 = vsub.f32 %v1234_v43, %v154_v32 }
  0xb0   :  { %v1421_v53 = vsub.f32 %v1239_v44, %v151_v31 }
  0xb1   :  { %v960_v59 = vpop.eup %959  ;;  %v198_v56 = vmul.f32 1.442695, %v1416_v38  ;;  %v196_v30 = vmul.f32 1.442695, %v1425_v28 }
  0xb2   :  { %v962_v12 = vpop.eup %961  ;;  %v225_v17 = vsel %vm124_vm0, %v960_v59, 0.0  ;;  %v194_v13 = vmul.f32 1.442695, %v1421_v53 }
  0xb3   :  { %v964_v9 = vpop.eup %963  ;;  %967 = vpow2.f32 %v198_v56  ;;  %v210_v36 = vsel %vm124_vm0, %v962_v12, 0.0 }
  0xb4   :  { %969 = vpow2.f32 %v188_v52  ;;  %v207_v42 = vsel %vm124_vm0, %v964_v9, 0.0  ;;  %v966_v39 = vpop.eup %965 }
  0xb5   :  { %971 = vpow2.f32 %v194_v13  ;;  %v222_v12 = vsel %vm124_vm0, %v966_v39, 0.0 }
  0xb6   :  { %211 = vadd.xlane.f32.xlu2 %v210_v36  ;;  %226 = vadd.xlane.f32.xlu1 %v225_v17  ;;  %v164_v31 = vpop.xlane.xlu1 %163  ;;  %973 = vpow2.f32 %v196_v30 }
  0xb7   :  { %208 = vadd.xlane.f32.xlu0 %v207_v42  ;;  %v160_v44 = vpop.xlane.xlu0 %159  ;;  %v1436_v52 = vsub.f32 %v1250_v48, %v164_v31 }
  0xb8   :  { %v1432_v32 = vsub.f32 %v1255_v49, %v160_v44 }
  0xb9   :  { %v968_v56 = vpop.eup %967  ;;  %v202_v36 = vmul.f32 1.442695, %v1436_v52 }
  0xba   :  { %v970_v59 = vpop.eup %969  ;;  %v234_v43 = vsel %vm124_vm0, %v968_v56, 0.0  ;;  %v200_v17 = vmul.f32 1.442695, %v1432_v32  ;;  %v523_v56 = vand.u32 65535, %v1268_v58  ;;  %v538_v58 = vand.u32 65535, %v1292_v16 }
  0xbb   :  { %v219_v9 = vsel %vm124_vm0, %v970_v59, 0.0  ;;  %v972_v42 = vpop.eup %971  ;;  %v493_v59 = vand.u32 65535, %v1272_v60  ;;  %v508_v60 = vand.u32 65535, %v1296_v21  ;;  %v583_v21 = vand.u32 65535, %v1318_v47 }
  0xbc   :  { %v974_v49 = vpop.eup %973  ;;  %975 = vpow2.f32 %v200_v17  ;;  %v228_v13 = vsel %vm124_vm0, %v972_v42, 0.0  ;;  %v613_v47 = vand.u32 65535, %v1332_v62  ;;  %v628_v62 = vand.u32 65535, %v1351_v41 }
  0xbd   :  { %977 = vpow2.f32 %v202_v36  ;;  %v231_v48 = vsel %vm124_vm0, %v974_v49, 0.0  ;;  %v495_v17 = vcvt.s32.f32 %v493_v59  ;;  %v568_v49 = vand.u32 65535, %v1289_v15 }
  0xbe   :  { %235 = vadd.xlane.f32.xlu1 %v234_v43  ;;  %220 = vadd.xlane.f32.xlu2 %v219_v9 }
  0xbf   :  { %223 = vadd.xlane.f32.xlu0 %v222_v12  ;;  %v525_v12 = vcvt.s32.f32 %v523_v56 }
  0xc2   :  { %v976_v30 = vpop.eup %975 }
  0xc3   :  { %v978_v44 = vpop.eup %977  ;;  %v237_v39 = vsel %vm124_vm0, %v976_v30, 0.0 }
  0xc4   :  { %v240_v31 = vsel %vm161_vm1, %v978_v44, 0.0  ;;  %v510_v44 = vcvt.s32.f32 %v508_v60 }
  0xc6   :  { %229 = vadd.xlane.f32.xlu2 %v228_v13 }
  0xc7   :  { %232 = vadd.xlane.f32.xlu0 %v231_v48 }
  0xce   :  { %238 = vadd.xlane.f32.xlu2 %v237_v39  ;;  %v570_v39 = vcvt.s32.f32 %v568_v49 }
  0xcf   :  { %241 = vadd.xlane.f32.xlu0 %v240_v31  ;;  %v553_v31 = vand.u32 65535, %v1309_v35  ;;  %v598_v35 = vand.u32 65535, %v1335_v4  ;;  %v630_v4 = vcvt.s32.f32 %v628_v62 }
  0xf1   :  { %v1448_v43 = vpop.xlane.xlu1 %527 }
  0xf2   :  { %v1450_v9 = vpop.xlane.xlu2 %497  ;;  %vm529_vm15 = vcmp.eq.f32.partialorder %v1276_v63, %v1448_v43  ;;  %v540_v63 = vcvt.s32.f32 %v538_v58  ;;  %v600_v58 = vcvt.s32.f32 %v598_v35 }
  0xf3   :  { %vm499_vm2 = vcmp.eq.f32.partialorder %v1278_v3, %v1450_v9  ;;  %v530_v36 = vsel %vm529_vm15, %v525_v12, inf  ;;  %v555_v12 = vcvt.s32.f32 %v553_v31 }
  0xf4   :  { %v500_v42 = vsel %vm499_vm2, %v495_v17, inf  ;;  %531 = vmin.xlane.f32.xlu0 %v530_v36  ;;  %v615_v36 = vcvt.s32.f32 %v613_v47 }
  0xf5   :  { %501 = vmin.xlane.f32.xlu1 %v500_v42 }
  0xf9   :  { %v1459_v13 = vpop.xlane.xlu1 %572 }
  0xfa   :  { %v1461_v48 = vpop.xlane.xlu0 %512  ;;  %v1463_v30 = vpop.xlane.xlu2 %542  ;;  %vm574_vm3 = vcmp.eq.f32.partialorder %v1304_v33, %v1459_v13  ;;  %v585_v33 = vcvt.s32.f32 %v583_v21 }
  0xfb   :  { %vm544_vm4 = vcmp.eq.f32.partialorder %v1302_v29, %v1463_v30  ;;  %vm514_vm5 = vcmp.eq.f32.partialorder %v1306_v34, %v1461_v48  ;;  %v575_v16 = vsel %vm574_vm3, %v570_v39, inf }
  0xfc   :  { %v545_v3 = vsel %vm544_vm4, %v540_v63, inf  ;;  %v515_v15 = vsel %vm514_vm5, %v510_v44, inf  ;;  %576 = vmin.xlane.f32.xlu0 %v575_v16  ;;  %v658_v63 = vand.u32 65535, %v1371_v40  ;;  %v673_v40 = vand.u32 65535, %v1399_v23 }
  0xfd   :  { %546 = vmin.xlane.f32.xlu1 %v545_v3  ;;  %516 = vmin.xlane.f32.xlu2 %v515_v15 }
  0xfe   :  { %v660_v39 = vcvt.s32.f32 %v658_v63  ;;  %v675_v31 = vcvt.s32.f32 %v673_v40 }
 0x102   :  { %v1473_v56 = vpop.xlane.xlu0 %557  ;;  %v1475_v59 = vpop.xlane.xlu2 %587 }
 0x103   :  { %vm589_vm6 = vcmp.eq.f32.partialorder %v1323_v54, %v1475_v59  ;;  %vm559_vm7 = vcmp.eq.f32.partialorder %v1321_v51, %v1473_v56 }
 0x104   :  { %v590_v29 = vsel %vm589_vm6, %v585_v33, inf  ;;  %v560_v34 = vsel %vm559_vm7, %v555_v12, inf }
 0x105   :  { %591 = vmin.xlane.f32.xlu1 %v590_v29  ;;  %561 = vmin.xlane.f32.xlu2 %v560_v34 }
 0x109   :  { %v1483_v17 = vpop.xlane.xlu1 %617 }
 0x10a   :  { %v1485_v42 = vpop.xlane.xlu0 %602  ;;  %vm619_vm8 = vcmp.eq.f32.partialorder %v1339_v10, %v1483_v17  ;;  %v643_v10 = vand.u32 65535, %v1374_v22 }
 0x10b   :  { %vm604_vm9 = vcmp.eq.f32.partialorder %v1341_v11, %v1485_v42  ;;  %v620_v51 = vsel %vm619_vm8, %v615_v36, inf }
 0x10c   :  { %v605_v54 = vsel %vm604_vm9, %v600_v58, inf  ;;  %621 = vmin.xlane.f32.xlu0 %v620_v51  ;;  %v645_v15 = vcvt.s32.f32 %v643_v10 }
 0x10d   :  { %606 = vmin.xlane.f32.xlu2 %v605_v54 }
 0x111   :  { %v1492_v60 = vpop.xlane.xlu1 %632 }
 0x112   :  { %vm634_vm10 = vcmp.eq.f32.partialorder %v1361_v57, %v1492_v60 }
 0x113   :  { %v635_v49 = vsel %vm634_vm10, %v630_v4, inf }
 0x114   :  { %636 = vmin.xlane.f32.xlu1 %v635_v49 }
 0x119   :  { %v1498_v44 = vpop.xlane.xlu2 %662  ;;  %v215_v11 = vpop.xlane.xlu1 %214 }
 0x11a   :  { %v1500_v3 = vpop.xlane.xlu0 %647  ;;  %vm664_vm11 = vcmp.eq.f32.partialorder %v1381_v46, %v1498_v44  ;;  %979 = vlog2.f32 %v215_v11 }
 0x11b   :  { %vm649_vm12 = vcmp.eq.f32.partialorder %v1386_v5, %v1500_v3  ;;  %v665_v41 = vsel %vm664_vm11, %v660_v39, inf }
 0x11c   :  { %v650_v57 = vsel %vm649_vm12, %v645_v15, inf  ;;  %666 = vmin.xlane.f32.xlu0 %v665_v41 }
 0x11d   :  { %651 = vmin.xlane.f32.xlu2 %v650_v57 }
 0x120   :  { %v980_v33 = vpop.eup %979 }
 0x121   :  { %v206_v22 = vpop.xlane.xlu2 %205  ;;  %v218_v21 = vpop.xlane.xlu1 %217  ;;  %v250_v23 = vmul.f32 0.6931472, %v980_v33 }
 0x122   :  { %981 = vlog2.f32 %v206_v22  ;;  %v1507_v16 = vpop.xlane.xlu0 %677 }
 0x123   :  { %vm679_vm13 = vcmp.eq.f32.partialorder %v1409_v61, %v1507_v16  ;;  %983 = vlog2.f32 %v218_v21  ;;  %v272_v51 = vsub.f32 %v1347_v27, %v250_v23 }
 0x124   :  { %v680_v46 = vsel %vm679_vm13, %v675_v31, inf  ;;  %vm83_vm13 = vcmask 7168  }
 0x125   :  { %681 = vmin.xlane.f32.xlu1 %v680_v46  ;;  %v285_v11 = vmul.f32 %v272_v51, %v1108_v7 }
 0x127   :  { %v304_v22 = vsel %vm124_vm0, %v285_v11, 0.0 }
 0x128   :  { %v982_v5 = vpop.eup %981 }
 0x129   :  { %v244_v12 = vmul.f32 0.6931472, %v982_v5  ;;  %v212_v29 = vpop.xlane.xlu2 %211  ;;  %v227_v35 = vpop.xlane.xlu1 %226 }
 0x12a   :  { %985 = vlog2.f32 %v212_v29  ;;  %v209_v34 = vpop.xlane.xlu0 %208  ;;  %v984_v58 = vpop.eup %983 }
 0x12b   :  { %v269_v47 = vsub.f32 %v1356_v50, %v244_v12  ;;  %987 = vlog2.f32 %v209_v34 }
 0x12c   :  { %989 = vlog2.f32 %v227_v35 }
 0x12d   :  { %v282_v36 = vmul.f32 %v269_v47, %v1092_v2  ;;  %v252_v2 = vmul.f32 0.6931472, %v984_v58 }
 0x12f   :  { %v295_v61 = vsel %vm124_vm0, %v282_v36, 0.0  ;;  %v273_v31 = vsub.f32 %v1359_v55, %v252_v2 }
 0x130   :  { %v986_v54 = vpop.eup %985  ;;  %296 = vadd.xlane.f32.xlu2 %v295_v61 }
 0x131   :  { %v988_v62 = vpop.eup %987  ;;  %v248_v4 = vmul.f32 0.6931472, %v986_v54  ;;  %v221_v49 = vpop.xlane.xlu2 %220  ;;  %v286_v55 = vmul.f32 %v273_v31, %v1082_v0  ;;  %v504_v31 = vcvt.f32.s32 %v1450_v9  ;;  %v534_v9 = vcvt.f32.s32 %v1448_v43 }
 0x132   :  { %v246_v63 = vmul.f32 0.6931472, %v988_v62  ;;  %991 = vlog2.f32 %v221_v49  ;;  %v224_v10 = vpop.xlane.xlu0 %223  ;;  %v236_v15 = vpop.xlane.xlu1 %235 }
 0x133   :  { %v271_v50 = vsub.f32 %v1379_v45, %v248_v4  ;;  %993 = vlog2.f32 %v224_v10  ;;  %v990_v57 = vpop.eup %989 }
 0x134   :  { %v270_v39 = vsub.f32 %v1384_v26, %v246_v63  ;;  %995 = vlog2.f32 %v236_v15  ;;  %v258_v5 = vmul.f32 0.6931472, %v990_v57 }
 0x135   :  { %v284_v27 = vmul.f32 %v271_v50, %v1087_v1 }
 0x136   :  { %v283_v41 = vmul.f32 %v270_v39, %v1113_v8  ;;  %v276_v36 = vsub.f32 %v1393_v19, %v258_v5 }
 0x137   :  { %v301_v40 = vsel %vm124_vm0, %v284_v27, 0.0 }
 0x138   :  { %v992_v21 = vpop.eup %991  ;;  %v298_v45 = vsel %vm124_vm0, %v283_v41, 0.0  ;;  %302 = vadd.xlane.f32.xlu1 %v301_v40  ;;  %305 = vadd.xlane.f32.xlu2 %v304_v22  ;;  %v289_v19 = vmul.f32 %v276_v36, %v1155_v20  ;;  %v1756_v40 = vld [vmem:[#allocation6_spill] sm:$0xff] }
 0x139   :  { %v994_v7 = vpop.eup %993  ;;  %v254_v46 = vmul.f32 0.6931472, %v992_v21  ;;  %299 = vadd.xlane.f32.xlu0 %v298_v45  ;;  %v230_v1 = vpop.xlane.xlu2 %229  ;;  %v505_v45 = vshll.u32 %v504_v31, 16 }
 0x13a   :  { %v256_v26 = vmul.f32 0.6931472, %v994_v7  ;;  %997 = vlog2.f32 %v230_v1  ;;  %v233_v8 = vpop.xlane.xlu0 %232  ;;  %v996_v23 = vpop.eup %995  ;;  %v519_v1 = vcvt.f32.s32 %v1461_v48  ;;  %v535_v48 = vshll.u32 %v534_v9, 16 }
 0x13b   :  { %v274_v33 = vsub.f32 %v1407_v37, %v254_v46  ;;  %999 = vlog2.f32 %v233_v8  ;;  %v307_v37 = vsel %vm124_vm0, %v286_v55, 0.0  ;;  %v264_v54 = vmul.f32 0.6931472, %v996_v23 }
 0x13c   :  { %v275_v12 = vsub.f32 %v1404_v24, %v256_v26  ;;  %v549_v8 = vcvt.f32.s32 %v1463_v30  ;;  %v520_v55 = vshll.u32 %v519_v1, 16  ;;  %v564_v30 = vcvt.f32.s32 %v1473_v56 }
 0x13d   :  { %v287_v29 = vmul.f32 %v274_v33, %v1103_v6  ;;  %v279_v50 = vsub.f32 %v1416_v38, %v264_v54  ;;  %v1757_v33 = vld [vmem:[#allocation9_spill] sm:$0xff]  ;;  %v654_v9 = vcvt.f32.s32 %v1500_v3  ;;  %v684_v3 = vcvt.f32.s32 %v1507_v16 }
 0x13e   :  { %v288_v34 = vmul.f32 %v275_v12, %v1134_v14  ;;  %v550_v23 = vshll.u32 %v549_v8, 16 }
 0x13f   :  { %v310_v47 = vsel %vm124_vm0, %v287_v29, 0.0 }
 0x140   :  { %v998_v35 = vpop.eup %997  ;;  %311 = vadd.xlane.f32.xlu1 %v310_v47  ;;  %v313_v58 = vsel %vm124_vm0, %v288_v34, 0.0 }
 0x141   :  { %v1000_v51 = vpop.eup %999  ;;  %v260_v61 = vmul.f32 0.6931472, %v998_v35  ;;  %314 = vadd.xlane.f32.xlu2 %v313_v58  ;;  %308 = vadd.xlane.f32.xlu0 %v307_v37  ;;  %v239_v0 = vpop.xlane.xlu2 %238 }
 0x142   :  { %v262_v24 = vmul.f32 0.6931472, %v1000_v51  ;;  %1001 = vlog2.f32 %v239_v0  ;;  %v242_v6 = vpop.xlane.xlu0 %241  ;;  %v594_v51 = vcvt.f32.s32 %v1475_v59 }
 0x143   :  { %v277_v14 = vsub.f32 %v1421_v53, %v260_v61  ;;  %1003 = vlog2.f32 %v242_v6  ;;  %v316_v53 = vsel %vm124_vm0, %v289_v19, 0.0  ;;  %v579_v6 = vcvt.f32.s32 %v1459_v13 }
 0x144   :  { %v278_v62 = vsub.f32 %v1425_v28, %v262_v24  ;;  %v595_v56 = vshll.u32 %v594_v51, 16 }
 0x145   :  { %v290_v4 = vmul.f32 %v277_v14, %v1145_v18  ;;  %v1754_v18 = vld [vmem:[#allocation7_spill] sm:$0xff] }
 0x146   :  { %v291_v49 = vmul.f32 %v278_v62, %v1171_v25  ;;  %v292_v27 = vmul.f32 %v279_v50, %v1754_v18  ;;  %v1755_v25 = vld [vmem:[#allocation8_spill] sm:$0xff]  ;;  %v565_v62 = vshll.u32 %v564_v30, 16 }
 0x147   :  { %v319_v63 = vsel %vm124_vm0, %v290_v4, 0.0 }
 0x148   :  { %v1002_v10 = vpop.eup %1001  ;;  %320 = vadd.xlane.f32.xlu1 %v319_v63  ;;  %v322_v11 = vsel %vm124_vm0, %v291_v49, 0.0  ;;  %v325_v57 = vsel %vm124_vm0, %v292_v27, 0.0 }
 0x149   :  { %v1004_v2 = vpop.eup %1003  ;;  %323 = vadd.xlane.f32.xlu2 %v322_v11  ;;  %317 = vadd.xlane.f32.xlu0 %v316_v53  ;;  %v266_v39 = vmul.f32 0.6931472, %v1002_v10  ;;  %v580_v10 = vshll.u32 %v579_v6, 16  ;;  %v609_v53 = vcvt.f32.s32 %v1485_v42 }
 0x14a   :  { %v268_v28 = vmul.f32 0.6931472, %v1004_v2 }
 0x14b   :  { %v280_v41 = vsub.f32 %v1432_v32, %v266_v39  ;;  %v1554_v32 = vld [vmem:[%s1742_s2] ss:$0 sm:$0xff]  ;;  %v610_v42 = vshll.u32 %v609_v53, 16  ;;  %s1058_s2 = smov [#allocation3]  }
 0x14c   :  { %v281_v20 = vsub.f32 %v1436_v52, %v268_v28  ;;  %s925_s10 = sshll.u32 %s1058_s2, 4  ;;  %s926_s10 = int_to_ptr.vmem [resolvable:$true] %s925_s10 }
 0x14d   :  { %v293_v22 = vmul.f32 %v280_v41, %v1756_v40 }
 0x14e   :  { %v294_v15 = vmul.f32 %v281_v20, %v1755_v25  ;;  %v624_v20 = vcvt.f32.s32 %v1483_v17  ;;  %v639_v17 = vcvt.f32.s32 %v1492_v60  ;;  %v669_v60 = vcvt.f32.s32 %v1498_v44 }
 0x14f   :  { %v328_v21 = vsel %vm124_vm0, %v293_v22, 0.0 }
 0x150   :  { %v331_v38 = vsel %vm161_vm1, %v294_v15, 0.0  ;;  %v625_v40 = vshll.u32 %v624_v20, 16  ;;  %v640_v1 = vshll.u32 %v639_v17, 16 }
 0x151   :  { %332 = vadd.xlane.f32.xlu1 %v331_v38  ;;  %326 = vadd.xlane.f32.xlu0 %v325_v57 }
 0x159   :  { %329 = vadd.xlane.f32.xlu0 %v328_v21 }
 0x167   :  { %v532_v26 = vpop.xlane.xlu0 %531 }
 0x168   :  { %v502_v52 = vpop.xlane.xlu1 %501  ;;  %v533_v47 = vcvt.f32.s32 %v532_v26 }
 0x169   :  { %v503_v7 = vcvt.f32.s32 %v502_v52 }
 0x16a   :  { %v536_v61 = vadd.s32 %v535_v48, %v533_v47 }
 0x16b   :  { %v506_v46 = vadd.s32 %v505_v45, %v503_v7 }
 0x16c   :  { %vm689_vm3 = vcmp.eq.s32.totalorder %v1757_v33, %v536_v61 }
 0x16d   :  { %vm687_vm14 = vcmp.eq.s32.totalorder %v1757_v33, %v506_v46  ;;  %v706_v13 = vsel %vm689_vm3, %v1554_v32, 0.0 }
 0x16e   :  { %v704_v5 = vsel %vm687_vm14, %v1554_v32, 0.0  ;;  %v723_v27 = vsel %vm124_vm0, %v706_v13, 0.0  ;;  %vm916_vm14 = vcmp.eq.s32.totalorder %v1757_v33, 0 }
 0x16f   :  { %v717_v12 = vsel %vm124_vm0, %v704_v5, 0.0  ;;  %v577_v43 = vpop.xlane.xlu0 %576 }
 0x170   :  { %v517_v29 = vpop.xlane.xlu2 %516  ;;  %718 = vadd.xlane.f32.xlu1 %v717_v12  ;;  %v547_v34 = vpop.xlane.xlu1 %546  ;;  %v578_v4 = vcvt.f32.s32 %v577_v43 }
 0x171   :  { %v518_v35 = vcvt.f32.s32 %v517_v29  ;;  %v548_v36 = vcvt.f32.s32 %v547_v34 }
 0x172   :  { %v581_v2 = vadd.s32 %v580_v10, %v578_v4 }
 0x173   :  { %v521_v58 = vadd.s32 %v520_v55, %v518_v35  ;;  %v551_v37 = vadd.s32 %v550_v23, %v548_v36  ;;  %v670_v23 = vshll.u32 %v669_v60, 16  ;;  %v655_v36 = vshll.u32 %v654_v9, 16 }
 0x174   :  { %vm692_vm6 = vcmp.eq.s32.totalorder %v1757_v33, %v581_v2 }
 0x175   :  { %vm688_vm15 = vcmp.eq.s32.totalorder %v1757_v33, %v521_v58  ;;  %vm690_vm2 = vcmp.eq.s32.totalorder %v1757_v33, %v551_v37  ;;  %v709_v21 = vsel %vm692_vm6, %v1554_v32, 0.0 }
 0x176   :  { %v705_v0 = vsel %vm688_vm15, %v1554_v32, 0.0  ;;  %v707_v24 = vsel %vm690_vm2, %v1554_v32, 0.0  ;;  %v732_v45 = vsel %vm124_vm0, %v709_v21, 0.0 }
 0x177   :  { %v720_v14 = vsel %vm124_vm0, %v705_v0, 0.0  ;;  %v726_v54 = vsel %vm124_vm0, %v707_v24, 0.0  ;;  %v685_v0 = vshll.u32 %v684_v3, 16 }
 0x178   :  { %v562_v19 = vpop.xlane.xlu2 %561  ;;  %721 = vadd.xlane.f32.xlu2 %v720_v14  ;;  %727 = vadd.xlane.f32.xlu0 %v726_v54  ;;  %v592_v59 = vpop.xlane.xlu1 %591 }
 0x179   :  { %v563_v49 = vcvt.f32.s32 %v562_v19  ;;  %v593_v63 = vcvt.f32.s32 %v592_v59  ;;  %v1057_v19 = vmov 0.0  }
 0x17a   :  { %84 = vst.msk [vmem:[#allocation2] sm:$0xff] %vm83_vm13, %v1057_v19 }
 0x17b   :  { %v566_v50 = vadd.s32 %v565_v62, %v563_v49  ;;  %v596_v11 = vadd.s32 %v595_v56, %v593_v63  ;;  %85 = vst.msk [vmem:[#allocation2 + $0x8] sm:$0xff] %vm83_vm13, %v1057_v19 }
 0x17c   :  { %86 = vst.msk [vmem:[#allocation2 + $0x10] sm:$0xff] %vm83_vm13, %v1057_v19 }
 0x17d   :  { %vm691_vm4 = vcmp.eq.s32.totalorder %v1757_v33, %v566_v50  ;;  %vm693_vm5 = vcmp.eq.s32.totalorder %v1757_v33, %v596_v11  ;;  %87 = vst.msk [vmem:[#allocation2 + $0x18] sm:$0xff] %vm83_vm13, %v1057_v19 }
 0x17e   :  { %v708_v28 = vsel %vm691_vm4, %v1554_v32, 0.0  ;;  %v710_v39 = vsel %vm693_vm5, %v1554_v32, 0.0  ;;  %88 = vst.msk [vmem:[#allocation2 + $0x20] sm:$0xff] %vm83_vm13, %v1057_v19 }
 0x17f   :  { %v622_v18 = vpop.xlane.xlu0 %621  ;;  %v729_v25 = vsel %vm124_vm0, %v708_v28, 0.0  ;;  %v735_v15 = vsel %vm124_vm0, %v710_v39, 0.0  ;;  %89 = vst.msk [vmem:[#allocation2 + $0x28] sm:$0xff] %vm83_vm13, %v1057_v19 }
 0x180   :  { %v607_v41 = vpop.xlane.xlu2 %606  ;;  %724 = vadd.xlane.f32.xlu2 %v723_v27  ;;  %730 = vadd.xlane.f32.xlu1 %v729_v25  ;;  %v623_v57 = vcvt.f32.s32 %v622_v18  ;;  %90 = vst.msk [vmem:[#allocation2 + $0x30] sm:$0xff] %vm83_vm13, %v1057_v19 }
 0x181   :  { %v608_v38 = vcvt.f32.s32 %v607_v41  ;;  %736 = vadd.xlane.f32.xlu0 %v735_v15  ;;  %91 = vst.msk [vmem:[#allocation2 + $0x38] sm:$0xff] %vm83_vm13, %v1057_v19 }
 0x182   :  { %v626_v31 = vadd.s32 %v625_v40, %v623_v57  ;;  %92 = vst.msk [vmem:[#allocation2 + $0x40] sm:$0xff] %vm83_vm13, %v1057_v19 }
 0x183   :  { %v611_v22 = vadd.s32 %v610_v42, %v608_v38  ;;  %93 = vst.msk [vmem:[#allocation2 + $0x48] sm:$0xff] %vm83_vm13, %v1057_v19 }
 0x184   :  { %vm695_vm8 = vcmp.eq.s32.totalorder %v1757_v33, %v626_v31  ;;  %94 = vst.msk [vmem:[#allocation2 + $0x50] sm:$0xff] %vm83_vm13, %v1057_v19 }
 0x185   :  { %vm694_vm7 = vcmp.eq.s32.totalorder %v1757_v33, %v611_v22  ;;  %v712_v5 = vsel %vm695_vm8, %v1554_v32, 0.0  ;;  %95 = vst.msk [vmem:[#allocation2 + $0x58] sm:$0xff] %vm83_vm13, %v1057_v19 }
 0x186   :  { %v711_v52 = vsel %vm694_vm7, %v1554_v32, 0.0  ;;  %v741_v34 = vsel %vm124_vm0, %v712_v5, 0.0 }
 0x187   :  { %v738_v7 = vsel %vm124_vm0, %v711_v52, 0.0  ;;  %v637_v46 = vpop.xlane.xlu1 %636 }
 0x188   :  { %733 = vadd.xlane.f32.xlu2 %v732_v45  ;;  %739 = vadd.xlane.f32.xlu1 %v738_v7  ;;  %v638_v26 = vcvt.f32.s32 %v637_v46 }
 0x18a   :  { %v641_v8 = vadd.s32 %v640_v1, %v638_v26 }
 0x18c   :  { %vm696_vm9 = vcmp.eq.s32.totalorder %v1757_v33, %v641_v8 }
 0x18d   :  { %v713_v12 = vsel %vm696_vm9, %v1554_v32, 0.0 }
 0x18e   :  { %v744_v55 = vsel %vm124_vm0, %v713_v12, 0.0 }
 0x18f   :  { %v667_v29 = vpop.xlane.xlu0 %666  ;;  %745 = vadd.xlane.f32.xlu0 %v744_v55 }
 0x190   :  { %v652_v47 = vpop.xlane.xlu2 %651  ;;  %v668_v35 = vcvt.f32.s32 %v667_v29  ;;  %742 = vadd.xlane.f32.xlu2 %v741_v34 }
 0x191   :  { %v653_v44 = vcvt.f32.s32 %v652_v47 }
 0x192   :  { %v671_v48 = vadd.s32 %v670_v23, %v668_v35  ;;  %v799_v23 = vld [vmem:[#allocation2] sm:$0xff] }
 0x193   :  { %v656_v58 = vadd.s32 %v655_v36, %v653_v44 }
 0x194   :  { %vm698_vm10 = vcmp.eq.s32.totalorder %v1757_v33, %v671_v48 }
 0x195   :  { %v715_v37 = vsel %vm698_vm10, %v1554_v32, 0.0  ;;  %vm697_vm11 = vcmp.eq.s32.totalorder %v1757_v33, %v656_v58 }
 0x196   :  { %v750_v30 = vsel %vm124_vm0, %v715_v37, 0.0  ;;  %v714_v51 = vsel %vm697_vm11, %v1554_v32, 0.0 }
 0x197   :  { %v747_v61 = vsel %vm124_vm0, %v714_v51, 0.0  ;;  %vm96_vm0 = vcmask 3072  }
 0x198   :  { %751 = vadd.xlane.f32.xlu2 %v750_v30  ;;  %748 = vadd.xlane.f32.xlu1 %v747_v61  ;;  %v682_v43 = vpop.xlane.xlu1 %681  ;;  %97 = vst.msk [vmem:[#allocation2 + $0x60] sm:$0xf] %vm96_vm0, %v1057_v19 }
 0x199   :  { %v683_v24 = vcvt.f32.s32 %v682_v43 }
 0x19b   :  { %v686_v6 = vadd.s32 %v685_v0, %v683_v24 }
 0x19d   :  { %vm699_vm12 = vcmp.eq.s32.totalorder %v1757_v33, %v686_v6 }
 0x19e   :  { %v716_v16 = vsel %vm699_vm12, %v1554_v32, 0.0 }
 0x19f   :  { %v753_v14 = vsel %vm161_vm1, %v716_v16, 0.0 }
 0x1a0   :  { %754 = vadd.xlane.f32.xlu0 %v753_v14 }
 0x1a3   :  { %v297_v56 = vpop.xlane.xlu2 %296 }
 0x1a4   :  { %v334_v32 = vsub.f32 0.0, %v297_v56  ;;  %v800_v56 = vld [vmem:[#allocation2 + $0x8] sm:$0xff] }
 0x1a6   :  { %v347_v49 = vsub.f32 0.0, %v334_v32 }
 0x1a8   :  { %v360_v50 = vmul.f32 1.442695, %v347_v49  ;;  %v802_v49 = vld [vmem:[#allocation2 + $0x18] sm:$0xff] }
 0x1aa   :  { %1005 = vpow2.f32 %v360_v50 }
 0x1ab   :  { %v1609_v62 = vpop.xlane.xlu1 %302  ;;  %v1635_v63 = vpop.xlane.xlu2 %305 }
 0x1ac   :  { %v1607_v54 = vpop.xlane.xlu0 %299  ;;  %v337_v10 = vsub.f32 0.0, %v1635_v63  ;;  %v336_v18 = vsub.f32 0.0, %v1609_v62  ;;  %v805_v62 = vld [vmem:[#allocation2 + $0x30] sm:$0xff] }
 0x1ad   :  { %v335_v11 = vsub.f32 0.0, %v1607_v54 }
 0x1ae   :  { %v350_v53 = vsub.f32 0.0, %v337_v10  ;;  %v349_v42 = vsub.f32 0.0, %v336_v18 }
 0x1af   :  { %v348_v2 = vsub.f32 0.0, %v335_v11 }
 0x1b0   :  { %v366_v20 = vmul.f32 1.442695, %v350_v53  ;;  %v1006_v41 = vpop.eup %1005  ;;  %v364_v21 = vmul.f32 1.442695, %v349_v42 }
 0x1b1   :  { %v362_v27 = vmul.f32 1.442695, %v348_v2  ;;  %v386_v22 = vsub.f32 1.0, %v1006_v41 }
 0x1b2   :  { %1007 = vpow2.f32 %v366_v20 }
 0x1b3   :  { %v1629_v4 = vpop.xlane.xlu1 %311  ;;  %1009 = vpow2.f32 %v362_v27  ;;  %v399_v1 = vmul.f32 %v386_v22, %v386_v22 }
 0x1b4   :  { %v1623_v59 = vpop.xlane.xlu0 %308  ;;  %v1647_v39 = vpop.xlane.xlu2 %314  ;;  %v339_v31 = vsub.f32 0.0, %v1629_v4  ;;  %1011 = vpow2.f32 %v364_v21 }
 0x1b5   :  { %v338_v25 = vsub.f32 0.0, %v1623_v59  ;;  %v340_v15 = vsub.f32 0.0, %v1647_v39  ;;  %v412_v9 = vmul.f32 %v399_v1, %v334_v32 }
 0x1b6   :  { %v352_v8 = vsub.f32 0.0, %v339_v31 }
 0x1b7   :  { %v351_v38 = vsub.f32 0.0, %v338_v25  ;;  %v353_v40 = vsub.f32 0.0, %v340_v15 }
 0x1b8   :  { %v1008_v7 = vpop.eup %1007  ;;  %v370_v47 = vmul.f32 1.442695, %v352_v8 }
 0x1b9   :  { %v368_v52 = vmul.f32 1.442695, %v351_v38  ;;  %v372_v46 = vmul.f32 1.442695, %v353_v40  ;;  %v1010_v26 = vpop.eup %1009  ;;  %v389_v55 = vsub.f32 1.0, %v1008_v7 }
 0x1ba   :  { %v387_v12 = vsub.f32 1.0, %v1010_v26  ;;  %v1012_v58 = vpop.eup %1011 }
 0x1bb   :  { %v1645_v28 = vpop.xlane.xlu1 %320  ;;  %1013 = vpow2.f32 %v368_v52  ;;  %v402_v30 = vmul.f32 %v389_v55, %v389_v55  ;;  %v388_v16 = vsub.f32 1.0, %v1012_v58 }
 0x1bc   :  { %v1643_v13 = vpop.xlane.xlu0 %317  ;;  %v1666_v60 = vpop.xlane.xlu2 %323  ;;  %1015 = vpow2.f32 %v372_v46  ;;  %v342_v48 = vsub.f32 0.0, %v1645_v28  ;;  %v400_v37 = vmul.f32 %v387_v12, %v387_v12 }
 0x1bd   :  { %v341_v45 = vsub.f32 0.0, %v1643_v13  ;;  %v343_v35 = vsub.f32 0.0, %v1666_v60  ;;  %1017 = vpow2.f32 %v370_v47  ;;  %v415_v6 = vmul.f32 %v402_v30, %v337_v10 }
 0x1be   :  { %v355_v0 = vsub.f32 0.0, %v342_v48  ;;  %v413_v24 = vmul.f32 %v400_v37, %v335_v11  ;;  %v401_v11 = vmul.f32 %v388_v16, %v388_v16 }
 0x1bf   :  { %v354_v5 = vsub.f32 0.0, %v341_v45  ;;  %v356_v43 = vsub.f32 0.0, %v343_v35 }
 0x1c0   :  { %v376_v27 = vmul.f32 1.442695, %v355_v0  ;;  %v414_v46 = vmul.f32 %v401_v11, %v336_v18 }
 0x1c1   :  { %v374_v44 = vmul.f32 1.442695, %v354_v5  ;;  %v1014_v51 = vpop.eup %1013  ;;  %v378_v50 = vmul.f32 1.442695, %v356_v43 }
 0x1c2   :  { %v1016_v61 = vpop.eup %1015  ;;  %v390_v14 = vsub.f32 1.0, %v1014_v51 }
 0x1c3   :  { %1019 = vpow2.f32 %v374_v44  ;;  %v392_v63 = vsub.f32 1.0, %v1016_v61  ;;  %v1018_v42 = vpop.eup %1017 }
 0x1c4   :  { %v1656_v57 = vpop.xlane.xlu0 %326  ;;  %v1660_v17 = vpop.xlane.xlu1 %332  ;;  %v403_v10 = vmul.f32 %v390_v14, %v390_v14  ;;  %1021 = vpow2.f32 %v378_v50  ;;  %v391_v26 = vsub.f32 1.0, %v1018_v42  ;;  %v804_v14 = vld [vmem:[#allocation2 + $0x28] sm:$0xff] }
 0x1c5   :  { %v344_v53 = vsub.f32 0.0, %v1656_v57  ;;  %v405_v21 = vmul.f32 %v392_v63, %v392_v63  ;;  %1023 = vpow2.f32 %v376_v27  ;;  %v346_v59 = vsub.f32 0.0, %v1660_v17 }
 0x1c6   :  { %v416_v1 = vmul.f32 %v403_v10, %v338_v25  ;;  %v404_v19 = vmul.f32 %v391_v26, %v391_v26 }
 0x1c7   :  { %v357_v52 = vsub.f32 0.0, %v344_v53  ;;  %v418_v12 = vmul.f32 %v405_v21, %v340_v15  ;;  %v359_v39 = vsub.f32 0.0, %v346_v59 }
 0x1c8   :  { %v417_v43 = vmul.f32 %v404_v19, %v339_v31  ;;  %v810_v19 = vld [vmem:[#allocation2 + $0x58] sm:$0xff] }
 0x1c9   :  { %v1020_v22 = vpop.eup %1019  ;;  %v384_v50 = vmul.f32 1.442695, %v359_v39 }
 0x1ca   :  { %v393_v8 = vsub.f32 1.0, %v1020_v22  ;;  %v1022_v58 = vpop.eup %1021 }
 0x1cb   :  { %v1024_v51 = vpop.eup %1023  ;;  %v395_v15 = vsub.f32 1.0, %v1022_v58 }
 0x1cc   :  { %v1670_v29 = vpop.xlane.xlu0 %329  ;;  %v406_v30 = vmul.f32 %v393_v8, %v393_v8 }
 0x1cd   :  { %v345_v41 = vsub.f32 0.0, %v1670_v29 }
 0x1ce   :  { %v419_v0 = vmul.f32 %v406_v30, %v341_v45 }
 0x1cf   :  { %v358_v7 = vsub.f32 0.0, %v345_v41 }
 0x1d1   :  { %v382_v25 = vmul.f32 1.442695, %v358_v7 }
 0x1e3   :  { %v719_v34 = vpop.xlane.xlu1 %718 }
 0x1e4   :  { %v756_v36 = vmul.f32 %v719_v34, %v412_v9  ;;  %v801_v9 = vld [vmem:[#allocation2 + $0x10] sm:$0xff]  ;;  %v803_v34 = vld [vmem:[#allocation2 + $0x20] sm:$0xff] }
 0x1e6   :  { %v838_v3 = vadd.f32 %v799_v23, %v756_v36  ;;  %v380_v23 = vmul.f32 1.442695, %v357_v52  ;;  %v808_v52 = vld [vmem:[#allocation2 + $0x48] sm:$0xff] }
 0x1e8   :  { %852 = vst.msk [vmem:[#allocation2] sm:$0xff] %vm83_vm13, %v838_v3  ;;  %1025 = vpow2.f32 %v380_v23 }
 0x1e9   :  { %1027 = vpow2.f32 %v382_v25 }
 0x1ea   :  { %1029 = vpow2.f32 %v384_v50 }
 0x1eb   :  { %v722_v54 = vpop.xlane.xlu2 %721  ;;  %v728_v32 = vpop.xlane.xlu0 %727 }
 0x1ec   :  { %v757_v2 = vmul.f32 %v722_v54, %v413_v24  ;;  %v759_v20 = vmul.f32 %v728_v32, %v415_v6  ;;  %v394_v24 = vsub.f32 1.0, %v1024_v51  ;;  %v809_v51 = vld [vmem:[#allocation2 + $0x50] sm:$0xff] }
 0x1ee   :  { %v839_v38 = vadd.f32 %v800_v56, %v757_v2  ;;  %v841_v40 = vadd.f32 %v802_v49, %v759_v20  ;;  %v806_v56 = vld [vmem:[#allocation2 + $0x38] sm:$0xff]  ;;  %v408_v2 = vmul.f32 %v395_v15, %v395_v15  ;;  %v1026_v27 = vpop.eup %1025  ;;  %v407_v31 = vmul.f32 %v394_v24, %v394_v24 }
 0x1ef   :  { %v869_v63 = vld [vmem:[#allocation2] sm:$0xff] }
 0x1f0   :  { %853 = vst.msk [vmem:[#allocation2 + $0x8] sm:$0xff] %vm83_vm13, %v839_v38  ;;  %v1028_v38 = vpop.eup %1027  ;;  %v882_v45 = vsel %vm83_vm13, %v869_v63, 0.0  ;;  %v421_v10 = vmul.f32 %v408_v2, %v343_v35  ;;  %v420_v22 = vmul.f32 %v407_v31, %v342_v48  ;;  %v811_v2 = vld [vmem:[#allocation2 + $0x60] sm:$0xf] }
 0x1f1   :  { %855 = vst.msk [vmem:[#allocation2 + $0x18] sm:$0xff] %vm83_vm13, %v841_v40  ;;  %v397_v7 = vsub.f32 1.0, %v1028_v38  ;;  %v1030_v28 = vpop.eup %1029 }
 0x1f2   :  { %v398_v58 = vsub.f32 1.0, %v1030_v28 }
 0x1f3   :  { %v725_v5 = vpop.xlane.xlu2 %724  ;;  %v731_v55 = vpop.xlane.xlu1 %730 }
 0x1f4   :  { %v758_v47 = vmul.f32 %v725_v5, %v414_v46  ;;  %v737_v36 = vpop.xlane.xlu0 %736  ;;  %v760_v18 = vmul.f32 %v731_v55, %v416_v1  ;;  %v396_v46 = vsub.f32 1.0, %v1026_v27  ;;  %v807_v5 = vld [vmem:[#allocation2 + $0x40] sm:$0xff] }
 0x1f5   :  { %v762_v44 = vmul.f32 %v737_v36, %v418_v12 }
 0x1f6   :  { %v840_v3 = vadd.f32 %v801_v9, %v758_v47  ;;  %v842_v37 = vadd.f32 %v803_v34, %v760_v18  ;;  %v410_v47 = vmul.f32 %v397_v7, %v397_v7  ;;  %v409_v60 = vmul.f32 %v396_v46, %v396_v46 }
 0x1f7   :  { %v844_v61 = vadd.f32 %v805_v62, %v762_v44  ;;  %v870_v6 = vld [vmem:[#allocation2 + $0x8] sm:$0xff] }
 0x1f8   :  { %854 = vst.msk [vmem:[#allocation2 + $0x10] sm:$0xff] %vm83_vm13, %v840_v3  ;;  %v883_v20 = vsel %vm83_vm13, %v870_v6, 0.0  ;;  %v872_v1 = vld [vmem:[#allocation2 + $0x18] sm:$0xff]  ;;  %v423_v25 = vmul.f32 %v410_v47, %v345_v41  ;;  %v422_v44 = vmul.f32 %v409_v60, %v344_v53 }
 0x1f9   :  { %858 = vst.msk [vmem:[#allocation2 + $0x30] sm:$0xff] %vm83_vm13, %v844_v61  ;;  %v884_v40 = vadd.f32 %v883_v20, %v882_v45  ;;  %v887_v34 = vsel %vm83_vm13, %v872_v1, 0.0  ;;  %v1758_v61 = vlaneseq }
 0x1fa   :  { %856 = vst.msk [vmem:[#allocation2 + $0x20] sm:$0xff] %vm83_vm13, %v842_v37 }
 0x1fb   :  { %v734_v16 = vpop.xlane.xlu2 %733  ;;  %v740_v54 = vpop.xlane.xlu1 %739  ;;  %v771_v39 = vshrl.u32 %v1758_v61, 7 }
 0x1fc   :  { %v761_v32 = vmul.f32 %v734_v16, %v417_v43  ;;  %v763_v49 = vmul.f32 %v740_v54, %v419_v0 }
 0x1fd   :  { %v783_v29 = vadd.s32 96, %v771_v39 }
 0x1fe   :  { %v843_v42 = vadd.f32 %v804_v14, %v761_v32  ;;  %v845_v4 = vadd.f32 %v806_v56, %v763_v49  ;;  %v411_v14 = vmul.f32 %v398_v58, %v398_v58 }
 0x1ff   :  { %v871_v13 = vld [vmem:[#allocation2 + $0x10] sm:$0xff]  ;;  %vm824_vm1 = vcmp.lt.s32.totalorder %v783_v29, 100 }
 0x200   :  { %857 = vst.msk [vmem:[#allocation2 + $0x28] sm:$0xff] %vm83_vm13, %v843_v42  ;;  %v885_v11 = vsel %vm83_vm13, %v871_v13, 0.0  ;;  %v875_v0 = vld [vmem:[#allocation2 + $0x30] sm:$0xff]  ;;  %v424_v56 = vmul.f32 %v411_v14, %v346_v59 }
 0x201   :  { %859 = vst.msk [vmem:[#allocation2 + $0x38] sm:$0xff] %vm83_vm13, %v845_v4  ;;  %v886_v26 = vadd.f32 %v885_v11, %v884_v40  ;;  %v873_v35 = vld [vmem:[#allocation2 + $0x20] sm:$0xff]  ;;  %v893_v41 = vsel %vm83_vm13, %v875_v0, 0.0 }
 0x202   :  { %v746_v21 = vpop.xlane.xlu0 %745  ;;  %v889_v62 = vsel %vm83_vm13, %v873_v35, 0.0 }
 0x203   :  { %v743_v8 = vpop.xlane.xlu2 %742  ;;  %v765_v9 = vmul.f32 %v746_v21, %v421_v10  ;;  %v888_v36 = vadd.f32 %v887_v34, %v886_v26 }
 0x204   :  { %v764_v12 = vmul.f32 %v743_v8, %v420_v22 }
 0x205   :  { %v847_v55 = vadd.f32 %v808_v52, %v765_v9  ;;  %v890_v3 = vadd.f32 %v889_v62, %v888_v36 }
 0x206   :  { %v846_v23 = vadd.f32 %v807_v5, %v764_v12 }
 0x207   :  { %861 = vst.msk [vmem:[#allocation2 + $0x48] sm:$0xff] %vm83_vm13, %v847_v55  ;;  %v874_v48 = vld [vmem:[#allocation2 + $0x28] sm:$0xff] }
 0x208   :  { %860 = vst.msk [vmem:[#allocation2 + $0x40] sm:$0xff] %vm83_vm13, %v846_v23  ;;  %v891_v18 = vsel %vm83_vm13, %v874_v48, 0.0  ;;  %v876_v57 = vld [vmem:[#allocation2 + $0x38] sm:$0xff] }
 0x209   :  { %v892_v24 = vadd.f32 %v891_v18, %v890_v3  ;;  %v895_v49 = vsel %vm83_vm13, %v876_v57, 0.0 }
 0x20b   :  { %v752_v37 = vpop.xlane.xlu2 %751  ;;  %v749_v30 = vpop.xlane.xlu1 %748  ;;  %v894_v54 = vadd.f32 %v893_v41, %v892_v24 }
 0x20c   :  { %v767_v15 = vmul.f32 %v752_v37, %v423_v25  ;;  %v766_v43 = vmul.f32 %v749_v30, %v422_v44 }
 0x20d   :  { %v896_v20 = vadd.f32 %v895_v49, %v894_v54 }
 0x20e   :  { %v849_v6 = vadd.f32 %v810_v19, %v767_v15  ;;  %v848_v16 = vadd.f32 %v809_v51, %v766_v43  ;;  %v878_v42 = vld [vmem:[#allocation2 + $0x48] sm:$0xff] }
 0x20f   :  { %v877_v53 = vld [vmem:[#allocation2 + $0x40] sm:$0xff]  ;;  %v899_v13 = vsel %vm83_vm13, %v878_v42, 0.0 }
 0x210   :  { %863 = vst.msk [vmem:[#allocation2 + $0x58] sm:$0xff] %vm83_vm13, %v849_v6  ;;  %v897_v63 = vsel %vm83_vm13, %v877_v53, 0.0 }
 0x211   :  { %862 = vst.msk [vmem:[#allocation2 + $0x50] sm:$0xff] %vm83_vm13, %v848_v16  ;;  %v898_v4 = vadd.f32 %v897_v63, %v896_v20 }
 0x213   :  { %v755_v32 = vpop.xlane.xlu0 %754  ;;  %v900_v59 = vadd.f32 %v899_v13, %v898_v4 }
 0x214   :  { %v768_v50 = vmul.f32 %v755_v32, %v424_v56 }
 0x216   :  { %v837_v27 = vsel %vm824_vm1, %v768_v50, 0.0 }
 0x217   :  { %v850_v31 = vadd.f32 %v837_v27, %v811_v2  ;;  %v880_v45 = vld [vmem:[#allocation2 + $0x58] sm:$0xff] }
 0x218   :  { %v879_v38 = vld [vmem:[#allocation2 + $0x50] sm:$0xff]  ;;  %v903_v11 = vsel %vm83_vm13, %v880_v45, 0.0 }
 0x219   :  { %865 = vst.msk [vmem:[#allocation2 + $0x60] sm:$0xf] %vm96_vm0, %v850_v31  ;;  %v901_v17 = vsel %vm83_vm13, %v879_v38, 0.0 }
 0x21a   :  { %v902_v40 = vadd.f32 %v901_v17, %v900_v59 }
 0x21c   :  { %v904_v22 = vadd.f32 %v903_v11, %v902_v40 }
 0x220   :  { %v881_v10 = vld [vmem:[#allocation2 + $0x60] sm:$0xf] }
 0x221   :  { %v905_v21 = vsel %vm96_vm0, %v881_v10, 0.0 }
 0x222   :  { %v906_v52 = vadd.f32 %v905_v21, %v904_v22 }
 0x224   :  { %907 = vadd.xlane.f32.xlu1 %v906_v52 }
 0x297   :  { %v908_v7 = vpop.xlane.xlu1 %907 }
 0x298   :  { %v909_v46 = vrot.slane %v908_v7, 4 }
 0x29a   :  { %v910_v1 = vadd.f32 %v909_v46, %v908_v7 }
 0x29c   :  { %v911_v26 = vrot.slane %v910_v1, 2 }
 0x29e   :  { %v912_v8 = vadd.f32 %v911_v26, %v910_v1 }
 0x2a0   :  { %v913_v5 = vrot.slane %v912_v8, 1 }
 0x2a2   :  { %v914_v9 = vadd.f32 %v913_v5, %v912_v8 }
 0x2a4   :  { %948 = vpush %v914_v9 }
 0x2d5   :  { %s949_s14 = spop %948 }
 0x2d6   :  { %v917_v12 = vstv %s949_s14 }
 0x2d7   :  { %v918_v55 = vsel %vm916_vm14, %v917_v12, 0.0 }
 0x2d8   :  { %919 = vst [vmem:[#allocation3] sm:$0x1] %v918_v55 }
 0x2d9   :  { %930 = dma.vmem_to_hbm [thread:$0]  %s926_s10, 16, %s928_s13, [#allocation4]  }
 0x2da   :  { %1055 = dma.done.wait [#allocation4], 16  }
 0x2db   :  { %1056 = vsyncadd [#allocation4], 4294967280 }
 0x2dc   :  { %935 = vsyncpa [#allocation4], 1 }

</bundles_post_ra>
